<compile_context>
chip_gen: v6e
topology: v6e:2x2x1
jax: 0.10.0
libtpu: 0.0.40
codegen_flags: <defaults>
</compile_context>

<pallas_src>
import jax
import jax.numpy as jnp
from jax import lax
from jax.experimental import pallas as pl
from jax.experimental.pallas import tpu as pltpu


# ----------------------------------------------------------------------------
# In-kernel helpers
# ----------------------------------------------------------------------------
def _conv3_fused(x, w, b_row, seg_len):
    """kernel_size=3, stride=1, padding=1 conv over each length-`seg_len` sequence
    of the (merged) lane axis, as a single MXU matmul.

    x: (C, TL) compute dtype, TL = nb*seg_len (nb whole sequences, lane-concatenated).
    w: (Cout, 3*C) compute dtype (fused taps).
    b_row: (Cout, TL) f32 broadcasted bias.
    """
    TL = x.shape[-1]
    pos = lax.broadcasted_iota(jnp.int32, x.shape, 1) % seg_len   # position inside its sequence
    zeros = jnp.zeros_like(x)
    # lane-axis rolls on the XLU + one-column masks instead of zero-pad shift copies
    x_m1 = jnp.where(pos == 0, zeros, pltpu.roll(x, 1, axis=1))                # x[:, l-1]
    x_p1 = jnp.where(pos == seg_len - 1, zeros, pltpu.roll(x, TL - 1, axis=1)) # x[:, l+1]
    x_cat = jnp.concatenate([x_m1, x, x_p1], axis=0)                           # (3C, TL)
    return jnp.dot(w, x_cat, preferred_element_type=jnp.float32) + b_row


def _make_resblock_kernel(apply_shortcut: bool, seg_len: int, cout: int, tl: int):
    if apply_shortcut:
        def kernel(x_ref, w1_ref, b1_ref, w2_ref, b2_ref, ws_ref, o_ref):
            x = x_ref[...]                                   # (Cin, TL)
            w1 = w1_ref[...]
            w2 = w2_ref[...]
            ws = ws_ref[...]
            # hoisted bias broadcasts (b2 already includes the shortcut's BN bias)
            b1 = jnp.broadcast_to(b1_ref[...], (cout, tl))
            b2 = jnp.broadcast_to(b2_ref[...], (cout, tl))
            out1 = jnp.maximum(_conv3_fused(x, w1, b1, seg_len), 0.0).astype(w2.dtype)
            main = _conv3_fused(out1, w2, b2, seg_len)
            sc = jnp.dot(ws, x, preferred_element_type=jnp.float32)   # 1x1 conv shortcut
            o_ref[...] = (sc + main).astype(o_ref.dtype)
    else:
        def kernel(x_ref, w1_ref, b1_ref, w2_ref, b2_ref, o_ref):
            x = x_ref[...]                                   # (C, TL)
            w1 = w1_ref[...]
            w2 = w2_ref[...]
            b1 = jnp.broadcast_to(b1_ref[...], (cout, tl))
            b2 = jnp.broadcast_to(b2_ref[...], (cout, tl))
            out1 = jnp.maximum(_conv3_fused(x, w1, b1, seg_len), 0.0).astype(w2.dtype)
            main = _conv3_fused(out1, w2, b2, seg_len)
            o_ref[...] = (x.astype(jnp.float32) + main).astype(o_ref.dtype)
    return kernel


# ----------------------------------------------------------------------------
# Wrapper
# ----------------------------------------------------------------------------
def _pick_batch_fold(n, L, cin, cout, itemsize, budget_bytes=8 << 20):
    """Largest divisor nb of n whose per-step working set fits the VMEM budget and
    whose lane block width nb*L is 128-aligned (or the full batch)."""
    # per batch element: double-buffered in/out blocks + ~4 f32 intermediates
    per_elem = L * (2 * (cin + cout) * itemsize + 4 * cout * 4)
    cands = [d for d in range(1, n + 1)
             if n % d == 0 and (d == n or (d * L) % 128 == 0)]
    fitting = [d for d in cands if d * per_elem <= budget_bytes]
    return max(fitting) if fitting else min(cands)


def resblock_pallas(x_ncl, kparams, apply_shortcut, compute_dtype=jnp.float32):
    """x_ncl: (N, Cin, L).  Returns (N, Cout, L) in compute_dtype."""
    N, Cin, L = x_ncl.shape
    Cout = kparams["w1"].shape[0]
    itemsize = jnp.dtype(compute_dtype).itemsize
    nb = _pick_batch_fold(N, L, Cin, Cout, itemsize)
    tl = nb * L

    # Lane-dense layout: batch concatenated along lanes -> (Cin, N*L).
    x_cl = jnp.transpose(x_ncl, (1, 0, 2)).reshape(Cin, N * L).astype(compute_dtype)
    w1 = kparams["w1"].astype(compute_dtype)
    w2 = kparams["w2"].astype(compute_dtype)
    b1 = kparams["b1"]                      # biases stay f32
    b2 = kparams["b2"]                      # (+ folded shortcut BN bias if any)

    kernel = _make_resblock_kernel(apply_shortcut, L, Cout, tl)

    in_specs = [
        pl.BlockSpec((Cin, tl), lambda i: (0, i)),            # x: nb sequences / step
        pl.BlockSpec((Cout, 3 * Cin), lambda i: (0, 0)),      # w1 (fused taps)
        pl.BlockSpec((Cout, 1), lambda i: (0, 0)),            # b1
        pl.BlockSpec((Cout, 3 * Cout), lambda i: (0, 0)),     # w2 (fused taps)
        pl.BlockSpec((Cout, 1), lambda i: (0, 0)),            # b2
    ]
    args = [x_cl, w1, b1, w2, b2]
    if apply_shortcut:
        in_specs.append(pl.BlockSpec((Cout, Cin), lambda i: (0, 0)))   # ws (1x1 conv)
        args.append(kparams["ws"].astype(compute_dtype))

    out_flat = pl.pallas_call(
        kernel,
        out_shape=jax.ShapeDtypeStruct((Cout, N * L), compute_dtype),
        grid=(N // nb,),
        in_specs=in_specs,
        out_specs=pl.BlockSpec((Cout, tl), lambda i: (0, i)),
        compiler_params=pltpu.CompilerParams(
            dimension_semantics=("parallel",),
            vmem_limit_bytes=64 * 1024 * 1024),
    )(*args)

    return jnp.transpose(out_flat.reshape(Cout, N, L), (1, 0, 2))


# ----------------------------------------------------------------------------
# Parameter construction (deterministic) + BN folding + tap fusion
# ----------------------------------------------------------------------------
def _fold_bn(w_oik, gamma, beta, mean, var, eps=1e-5):
    """Fold inference-mode BatchNorm1d into a bias-free conv (PyTorch (O, I, K) weight)."""
    scale = gamma / jnp.sqrt(var + eps)
    w_eff = w_oik * scale[:, None, None]          # (O, I, K)
    b_eff = beta - mean * scale                   # (O,)
    return w_eff, b_eff


def _fuse_taps(w_oik):
    """(O, I, K) -> (O, K*I) so the conv is one matmul against [x[l-1]; x[l]; x[l+1]]."""
    O, I, K = w_oik.shape
    return jnp.transpose(w_oik, (0, 2, 1)).reshape(O, K * I)


def make_params(key, in_feat, out_feat):
    ks = jax.random.split(key, 9)

    def bn(ki, kj, c):
        gamma = 1.0 + 0.1 * jax.random.normal(ki, (c,), jnp.float32)
        beta = 0.1 * jax.random.normal(kj, (c,), jnp.float32)
        mean = 0.05 * jax.random.normal(kj, (c,), jnp.float32)
        var = jnp.abs(1.0 + 0.1 * jax.random.normal(ki, (c,), jnp.float32))
        return gamma, beta, mean, var

    w1_raw = 0.2 * jax.random.normal(ks[0], (out_feat, in_feat, 3), jnp.float32)
    w2_raw = 0.2 * jax.random.normal(ks[1], (out_feat, out_feat, 3), jnp.float32)
    w1_o, b1_o = _fold_bn(w1_raw, *bn(ks[2], ks[3], out_feat))
    w2_o, b2_o = _fold_bn(w2_raw, *bn(ks[4], ks[5], out_feat))

    rparams = {"w1": w1_o, "b1": b1_o, "w2": w2_o, "b2": b2_o}
    kparams = {"w1": _fuse_taps(w1_o), "b1": b1_o[:, None], "w2": _fuse_taps(w2_o)}

    if in_feat != out_feat:
        ws_raw = 0.2 * jax.random.normal(ks[6], (out_feat, in_feat, 1), jnp.float32)
        ws_o, bs_o = _fold_bn(ws_raw, *bn(ks[7], ks[8], out_feat))
        rparams.update({"ws": ws_o, "bs": bs_o})
        kparams.update({"ws": ws_o[:, :, 0],
                        "b2": (b2_o + bs_o)[:, None]})   # fold shortcut BN bias into b2
    else:
        kparams["b2"] = b2_o[:, None]
    return kparams, rparams


# ----------------------------------------------------------------------------
# Pure-JAX reference (lax.conv) for validation
# ----------------------------------------------------------------------------
def _ref_conv(x_ncl, w_oik, b, pad):
    y = lax.conv_general_dilated(
        x_ncl, w_oik, window_strides=(1,), padding=[(pad, pad)],
        dimension_numbers=("NCH", "OIH", "NCH"))
    return y + b[None, :, None]


def ref_resblock(x_ncl, rparams, apply_shortcut):
    out1 = jnp.maximum(_ref_conv(x_ncl, rparams["w1"], rparams["b1"], 1), 0.0)
    main = _ref_conv(out1, rparams["w2"], rparams["b2"], 1)
    sc = _ref_conv(x_ncl, rparams["ws"], rparams["bs"], 0) if apply_shortcut else x_ncl
    return sc + main


# ----------------------------------------------------------------------------
if __name__ == "__main__":
    key = jax.random.PRNGKey(0)
    k_x, k_p1, k_p2 = jax.random.split(key, 3)

    N, L = 2, 16

    # Case 1: in_feat != out_feat (1x1-conv shortcut), f32 compute, tight check.
    Cin, Cout = 4, 8
    x = jax.random.normal(k_x, (N, Cin, L), jnp.float32)
    kparams, rparams = make_params(k_p1, Cin, Cout)
    y = jax.block_until_ready(resblock_pallas(x, kparams, apply_shortcut=True))
    y_ref = ref_resblock(x, rparams, apply_shortcut=True)
    assert y.shape == (N, Cout, L)
    assert jnp.allclose(y, y_ref, atol=1e-4, rtol=1e-4)

    # Case 2: in_feat == out_feat (identity shortcut), f32 compute, tight check.
    C = 8
    x2 = jax.random.normal(k_x, (N, C, L), jnp.float32)
    kparams2, rparams2 = make_params(k_p2, C, C)
    y2 = jax.block_until_ready(resblock_pallas(x2, kparams2, apply_shortcut=False))
    y2_ref = ref_resblock(x2, rparams2, apply_shortcut=False)
    assert y2.shape == (N, C, L)
    assert jnp.allclose(y2, y2_ref, atol=1e-4, rtol=1e-4)

    # Case 3: bf16 MXU path (bf16 dot inputs, f32 accumulation/elementwise), loose check.
    y3 = jax.block_until_ready(
        resblock_pallas(x, kparams, apply_shortcut=True, compute_dtype=jnp.bfloat16))
    assert y3.dtype == jnp.bfloat16
    assert jnp.allclose(y3.astype(jnp.float32), y_ref, atol=5e-2, rtol=5e-2)

    print("KERNEL_OK")
</pallas_src>

<mosaic_0001>
module attributes {stable_mosaic.version = 11 : i64} {
  func.func @kernel(%arg0: i32, %arg1: memref<4x32xf32, #tpu.memory_space<vmem>>, %arg2: memref<8x12xf32, #tpu.memory_space<vmem>>, %arg3: memref<8x1xf32, #tpu.memory_space<vmem>>, %arg4: memref<8x24xf32, #tpu.memory_space<vmem>>, %arg5: memref<8x1xf32, #tpu.memory_space<vmem>>, %arg6: memref<8x4xf32, #tpu.memory_space<vmem>>, %arg7: memref<8x32xf32, #tpu.memory_space<vmem>>) attributes {dimension_semantics = [#tpu.dimension_semantics<parallel>], iteration_bounds = array<i64: 1>, scalar_prefetch = 0 : i64, scratch_operands = 0 : i64, tpu.core_type = #tpu.core_type<tc>, window_params = [{transform_indices = @transform_0, window_bounds = array<i64: 4, 32>}, {pipeline_mode = #tpu.pipeline_mode<synchronous>, transform_indices = @transform_1, window_bounds = array<i64: 8, 12>}, {pipeline_mode = #tpu.pipeline_mode<synchronous>, transform_indices = @transform_2, window_bounds = array<i64: 8, 1>}, {pipeline_mode = #tpu.pipeline_mode<synchronous>, transform_indices = @transform_3, window_bounds = array<i64: 8, 24>}, {pipeline_mode = #tpu.pipeline_mode<synchronous>, transform_indices = @transform_4, window_bounds = array<i64: 8, 1>}, {pipeline_mode = #tpu.pipeline_mode<synchronous>, transform_indices = @transform_5, window_bounds = array<i64: 8, 4>}, {transform_indices = @transform_6, window_bounds = array<i64: 8, 32>}]} {
    %c0 = arith.constant 0 : index
    %c0_0 = arith.constant 0 : index
    %0 = vector.load %arg1[%c0, %c0_0] : memref<4x32xf32, #tpu.memory_space<vmem>>, vector<4x32xf32>
    %c0_1 = arith.constant 0 : index
    %c0_2 = arith.constant 0 : index
    %1 = vector.load %arg2[%c0_1, %c0_2] : memref<8x12xf32, #tpu.memory_space<vmem>>, vector<8x12xf32>
    %c0_3 = arith.constant 0 : index
    %c0_4 = arith.constant 0 : index
    %2 = vector.load %arg4[%c0_3, %c0_4] : memref<8x24xf32, #tpu.memory_space<vmem>>, vector<8x24xf32>
    %c0_5 = arith.constant 0 : index
    %c0_6 = arith.constant 0 : index
    %3 = vector.load %arg6[%c0_5, %c0_6] : memref<8x4xf32, #tpu.memory_space<vmem>>, vector<8x4xf32>
    %c0_7 = arith.constant 0 : index
    %c0_8 = arith.constant 0 : index
    %4 = vector.load %arg3[%c0_7, %c0_8] : memref<8x1xf32, #tpu.memory_space<vmem>>, vector<8x1xf32>
    %5 = vector.shape_cast %4 : vector<8x1xf32> to vector<8x1xf32>
    %6 = vector.broadcast %5 : vector<8x1xf32> to vector<8x32xf32>
    %c0_9 = arith.constant 0 : index
    %c0_10 = arith.constant 0 : index
    %7 = vector.load %arg5[%c0_9, %c0_10] : memref<8x1xf32, #tpu.memory_space<vmem>>, vector<8x1xf32>
    %8 = vector.shape_cast %7 : vector<8x1xf32> to vector<8x1xf32>
    %9 = vector.broadcast %8 : vector<8x1xf32> to vector<8x32xf32>
    %10 = tpu.iota {dimensions = array<i32: 1>} : vector<4x32xi32>
    %c16_i32 = arith.constant 16 : i32
    %c0_i32 = arith.constant 0 : i32
    %11 = arith.cmpi eq, %c16_i32, %c0_i32 : i32
    %c1_i32 = arith.constant 1 : i32
    %12 = arith.select %11, %c1_i32, %c16_i32 : i32
    %13 = vector.broadcast %12 : i32 to vector<4x32xi32>
    %14 = arith.remsi %10, %13 : vector<4x32xi32>
    %c0_i32_11 = arith.constant 0 : i32
    %15 = vector.broadcast %c0_i32_11 : i32 to vector<4x32xi32>
    %16 = arith.cmpi ne, %14, %15 : vector<4x32xi32>
    %c0_i32_12 = arith.constant 0 : i32
    %17 = vector.broadcast %c0_i32_12 : i32 to vector<4x32xi32>
    %18 = arith.cmpi slt, %14, %17 : vector<4x32xi32>
    %c0_i32_13 = arith.constant 0 : i32
    %19 = arith.cmpi slt, %12, %c0_i32_13 : i32
    %20 = vector.broadcast %19 : i1 to vector<4x32xi1>
    %21 = vector.broadcast %20 : vector<4x32xi1> to vector<4x32xi1>
    %22 = arith.xori %18, %21 : vector<4x32xi1>
    %23 = arith.andi %22, %16 : vector<4x32xi1>
    %24 = vector.broadcast %12 : i32 to vector<4x32xi32>
    %25 = arith.addi %14, %24 : vector<4x32xi32>
    %26 = arith.select %23, %25, %14 : vector<4x32xi1>, vector<4x32xi32>
    %cst = arith.constant 0.000000e+00 : f32
    %27 = vector.broadcast %cst : f32 to vector<4x32xf32>
    %c0_i32_14 = arith.constant 0 : i32
    %28 = vector.broadcast %c0_i32_14 : i32 to vector<4x32xi32>
    %29 = arith.cmpi eq, %26, %28 : vector<4x32xi32>
    %c1_i32_15 = arith.constant 1 : i32
    %30 = tpu.dynamic_rotate %0 by %c1_i32_15 dim 1 : vector<4x32xf32>, i32 -> vector<4x32xf32>
    %31 = arith.select %29, %27, %30 : vector<4x32xi1>, vector<4x32xf32>
    %c15_i32 = arith.constant 15 : i32
    %32 = vector.broadcast %c15_i32 : i32 to vector<4x32xi32>
    %33 = arith.cmpi eq, %26, %32 : vector<4x32xi32>
    %c31_i32 = arith.constant 31 : i32
    %34 = tpu.dynamic_rotate %0 by %c31_i32 dim 1 : vector<4x32xf32>, i32 -> vector<4x32xf32>
    %35 = arith.select %33, %27, %34 : vector<4x32xi1>, vector<4x32xf32>
    %36 = tpu.concatenate %31, %0, %35 in 0 : vector<4x32xf32>, vector<4x32xf32>, vector<4x32xf32> -> vector<12x32xf32>
    %cst_16 = arith.constant dense<0.000000e+00> : vector<8x32xf32>
    %37 = tpu.matmul %1, %36, %cst_16 {dimension_numbers = #tpu.dot_dimension_numbers<[1], [0], [0], [1], [0, 0, 1, 1], [], []>} : vector<8x12xf32>, vector<12x32xf32>, vector<8x32xf32> -> vector<8x32xf32>
    %38 = arith.addf %37, %6 : vector<8x32xf32>
    %cst_17 = arith.constant 0.000000e+00 : f32
    %39 = vector.broadcast %cst_17 : f32 to vector<8x32xf32>
    %40 = arith.maximumf %38, %39 : vector<8x32xf32>
    %41 = tpu.iota {dimensions = array<i32: 1>} : vector<8x32xi32>
    %c16_i32_18 = arith.constant 16 : i32
    %c0_i32_19 = arith.constant 0 : i32
    %42 = arith.cmpi eq, %c16_i32_18, %c0_i32_19 : i32
    %c1_i32_20 = arith.constant 1 : i32
    %43 = arith.select %42, %c1_i32_20, %c16_i32_18 : i32
    %44 = vector.broadcast %43 : i32 to vector<8x32xi32>
    %45 = arith.remsi %41, %44 : vector<8x32xi32>
    %c0_i32_21 = arith.constant 0 : i32
    %46 = vector.broadcast %c0_i32_21 : i32 to vector<8x32xi32>
    %47 = arith.cmpi ne, %45, %46 : vector<8x32xi32>
    %c0_i32_22 = arith.constant 0 : i32
    %48 = vector.broadcast %c0_i32_22 : i32 to vector<8x32xi32>
    %49 = arith.cmpi slt, %45, %48 : vector<8x32xi32>
    %c0_i32_23 = arith.constant 0 : i32
    %50 = arith.cmpi slt, %43, %c0_i32_23 : i32
    %51 = vector.broadcast %50 : i1 to vector<8x32xi1>
    %52 = vector.broadcast %51 : vector<8x32xi1> to vector<8x32xi1>
    %53 = arith.xori %49, %52 : vector<8x32xi1>
    %54 = arith.andi %53, %47 : vector<8x32xi1>
    %55 = vector.broadcast %43 : i32 to vector<8x32xi32>
    %56 = arith.addi %45, %55 : vector<8x32xi32>
    %57 = arith.select %54, %56, %45 : vector<8x32xi1>, vector<8x32xi32>
    %cst_24 = arith.constant 0.000000e+00 : f32
    %58 = vector.broadcast %cst_24 : f32 to vector<8x32xf32>
    %c0_i32_25 = arith.constant 0 : i32
    %59 = vector.broadcast %c0_i32_25 : i32 to vector<8x32xi32>
    %60 = arith.cmpi eq, %57, %59 : vector<8x32xi32>
    %c1_i32_26 = arith.constant 1 : i32
    %61 = tpu.dynamic_rotate %40 by %c1_i32_26 dim 1 : vector<8x32xf32>, i32 -> vector<8x32xf32>
    %62 = arith.select %60, %58, %61 : vector<8x32xi1>, vector<8x32xf32>
    %c15_i32_27 = arith.constant 15 : i32
    %63 = vector.broadcast %c15_i32_27 : i32 to vector<8x32xi32>
    %64 = arith.cmpi eq, %57, %63 : vector<8x32xi32>
    %c31_i32_28 = arith.constant 31 : i32
    %65 = tpu.dynamic_rotate %40 by %c31_i32_28 dim 1 : vector<8x32xf32>, i32 -> vector<8x32xf32>
    %66 = arith.select %64, %58, %65 : vector<8x32xi1>, vector<8x32xf32>
    %67 = tpu.concatenate %62, %40, %66 in 0 : vector<8x32xf32>, vector<8x32xf32>, vector<8x32xf32> -> vector<24x32xf32>
    %cst_29 = arith.constant dense<0.000000e+00> : vector<8x32xf32>
    %68 = tpu.matmul %2, %67, %cst_29 {dimension_numbers = #tpu.dot_dimension_numbers<[1], [0], [0], [1], [0, 0, 1, 1], [], []>} : vector<8x24xf32>, vector<24x32xf32>, vector<8x32xf32> -> vector<8x32xf32>
    %69 = arith.addf %68, %9 : vector<8x32xf32>
    %cst_30 = arith.constant dense<0.000000e+00> : vector<8x32xf32>
    %70 = tpu.matmul %3, %0, %cst_30 {dimension_numbers = #tpu.dot_dimension_numbers<[1], [0], [0], [1], [0, 0, 1, 1], [], []>} : vector<8x4xf32>, vector<4x32xf32>, vector<8x32xf32> -> vector<8x32xf32>
    %71 = arith.addf %70, %69 : vector<8x32xf32>
    %c0_31 = arith.constant 0 : index
    %c0_32 = arith.constant 0 : index
    %72 = vector.load %arg7[%c0_31, %c0_32] : memref<8x32xf32, #tpu.memory_space<vmem>>, vector<8x32xf32>
    tpu.vector_store %arg7[%c0_31, %c0_32], %71 {strides = array<i32>} : memref<8x32xf32, #tpu.memory_space<vmem>>, vector<8x32xf32>,
    return
  }
  func.func @transform_0(%arg0: i32) -> (i32, i32) {
    %c0_i32 = arith.constant 0 : i32
    %c0_i32_0 = arith.constant 0 : i32
    return %c0_i32, %arg0 : i32, i32
  }
  func.func @transform_1(%arg0: i32) -> (i32, i32) {
    %c0_i32 = arith.constant 0 : i32
    %c0_i32_0 = arith.constant 0 : i32
    %c0_i32_1 = arith.constant 0 : i32
    return %c0_i32, %c0_i32_0 : i32, i32
  }
  func.func @transform_2(%arg0: i32) -> (i32, i32) {
    %c0_i32 = arith.constant 0 : i32
    %c0_i32_0 = arith.constant 0 : i32
    %c0_i32_1 = arith.constant 0 : i32
    return %c0_i32, %c0_i32_0 : i32, i32
  }
  func.func @transform_3(%arg0: i32) -> (i32, i32) {
    %c0_i32 = arith.constant 0 : i32
    %c0_i32_0 = arith.constant 0 : i32
    %c0_i32_1 = arith.constant 0 : i32
    return %c0_i32, %c0_i32_0 : i32, i32
  }
  func.func @transform_4(%arg0: i32) -> (i32, i32) {
    %c0_i32 = arith.constant 0 : i32
    %c0_i32_0 = arith.constant 0 : i32
    %c0_i32_1 = arith.constant 0 : i32
    return %c0_i32, %c0_i32_0 : i32, i32
  }
  func.func @transform_5(%arg0: i32) -> (i32, i32) {
    %c0_i32 = arith.constant 0 : i32
    %c0_i32_0 = arith.constant 0 : i32
    %c0_i32_1 = arith.constant 0 : i32
    return %c0_i32, %c0_i32_0 : i32, i32
  }
  func.func @transform_6(%arg0: i32) -> (i32, i32) {
    %c0_i32 = arith.constant 0 : i32
    %c0_i32_0 = arith.constant 0 : i32
    return %c0_i32, %arg0 : i32, i32
  }
}

</mosaic_0001>

<bundles_post_ra>
// kernel: tpu_custom_call.1
= control target key start
LH: loop header
LB: loop body
LE: loop exit
PB: predicated region body
PF: predicated region fallthrough
CT: control target
= control target key end

     0   :  { %s508_s0 = inlined_call_operand.vmem [shape: f32[4,32], index: 0, kind: input, shape index: {}]   ;;  %s509_s1 = inlined_call_operand.vmem [shape: f32[8,12], index: 1, kind: input, shape index: {}]   ;;  %s510_s2 = inlined_call_operand.vmem [shape: f32[8,1], index: 2, kind: input, shape index: {}]   ;;  %s511_s3 = inlined_call_operand.vmem [shape: f32[8,24], index: 3, kind: input, shape index: {}]   ;;  %s512_s4 = inlined_call_operand.vmem [shape: f32[8,1], index: 4, kind: input, shape index: {}]   ;;  %s513_s5 = inlined_call_operand.vmem [shape: f32[8,4], index: 5, kind: input, shape index: {}]   ;;  %s514_s6 = inlined_call_operand.hbm [shape: f32[8,32], index: 6, kind: output, shape index: {}]  }
   0x1   :  { %v24_v0 = vld [vmem:[%s508_s0] sm:$0xf] }
   0x2   :  { %11 = vsyncpa [#allocation3], 0  ;;  %s405_s23 = smov 32   ;;  %vm55_vm0 = vcmask 1047808   ;;  %v406_v3 = vmov 0.0   ;;  %vm407_vm1 = vmmov 0   ;;  %v40_v8 = vlaneseq }
   0x3   :  { %56 = vrot.lane.b32.xlu0 %v24_v0, %s405_s23  ;;  %354 = vmatprep.subr.mxu0 %v406_v3  ;;  %v28_v4 = vld [vmem:[%s510_s2] sm:$0xff]  ;;  %v408_v5 = vmov 0   ;;  %s409_s25 = smov 127   ;;  %s410_s26 = smov 97   ;;  %vm75_vm3 = vcmask 1043456   ;;  %v73_v15 = vrot.slane %v24_v0, 4 }
   0x4   :  { %361 = vmatprep.subr.mxu1 %v406_v3  ;;  %358 = vmatprep.mubr.msk.f32.mxu0 %vm407_vm1, %v406_v3  ;;  %v41_v9 = vand.u32 127, %v40_v8  ;;  %v25_v18 = vld [vmem:[%s509_s1] sm:$0xff]  ;;  %vm77_vm5 = vcmask 97280   ;;  %vm244_vm6 = vcmask 31744   ;;  %vm170_vm9 = vcmask 195584  }
   0x5   :  { %367 = vmatprep.mubr.msk.f32.mxu1 %vm407_vm1, %v406_v3  ;;  %382 = vset.pattern.permute.xlu0 %v408_v5  ;;  %v27_v27 = vld [vmem:[%s513_s5] sm:$0xff]  ;;  %vm320_vm10 = vcmask 261120  }
   0x6   :  { %v46_v10 = vand.u32 15, %v41_v9  ;;  %v34_v30 = vld [vmem:[%s512_s4] sm:$0xff]  ;;  %s411_s4 = smov [#allocation2]  }
   0x7   :  { %v26_v32 = vld [vmem:[%s511_s3] sm:$0xff]  ;;  %s328_s8 = sshll.u32 %s411_s4, 4  ;;  %s329_s8 = int_to_ptr.vmem [resolvable:$true] %s328_s8 }
   0x8   :  { %vm465_vm2 = vcmp.eq.s32.totalorder %v46_v10, 15  ;;  %vm471_vm4 = vcmp.eq.s32.totalorder %v46_v10, 0  ;;  %s383_s9 = scalar_lea.vmem %s329_s8, 128  ;;  %p388_p1 = scmp.lt.s32.totalorder %s329_s8, %s329_s8 }
   0x9   :  { %vm338_vm7 = vmneg %vm465_vm2  ;;  %p384_p0 = scmp.ne.s32.totalorder %s329_s8, %s383_s9  ;;  %p389_p2 = scmp.lt.s32.totalorder %s383_s9, %s383_s9 }
   0xa   :  { %vm340_vm8 = vmneg %vm471_vm4 }
   0xb   :  { %p390_p3 = por %p389_p2, %p388_p1 }
   0xd   :  { %p391_p4 = pnand %p390_p3, %p384_p0 }
  0x75   :  { %v57_v1 = vpop.permute.xlu0 %56 }
  0x76   :  { %v58_v2 = vsel %vm55_vm0, %v57_v1, %v24_v0 }
  0x77   :  { %59 = vrot.lane.b32.xlu0 %v58_v2, %s405_s23 }
  0x7b   :  { %31 = vperm.xlu0 %382, %v28_v4  }
  0xe9   :  { %v60_v6 = vpop.permute.xlu0 %59 }
  0xea   :  { %v61_v7 = vsel %vm55_vm0, %v60_v6, %v24_v0 }
  0xeb   :  { %68 = vrot.lane.b32.xlu1 %v61_v7, %s409_s25 }
  0xef   :  { %63 = vrot.lane.b32.xlu1 %v61_v7, %s410_s26 }
  0xf6   :  { %v32_v20 = vpop.permute.xlu0 %31 }
 0x15d   :  { %v69_v12 = vpop.permute.xlu1 %68 }
 0x15e   :  { %v71_v13 = vsel %vm465_vm2, 0.0, %v69_v12 }
 0x15f   :  { %355 = vmatpush3.msk.msra.mxu0 %vm75_vm3, %v71_v13 }
 0x160   :  { %356 = vmatprep.subr.mxu0 %v406_v3 }
 0x161   :  { %v64_v16 = vpop.permute.xlu1 %63 }
 0x162   :  { %v66_v17 = vsel %vm471_vm4, 0.0, %v64_v16 }
 0x163   :  { %v76_v19 = vsel %vm75_vm3, %v66_v17, %v73_v15 }
 0x164   :  { %357 = vmatpush3.msra.mxu0 %v76_v19 }
 0x165   :  { %359 = vmatmul.mubr.msk.f32.vlgmr.msra.gmra.mxu0 %vm77_vm5, %v25_v18  ;;  %370 = vmatprep.subr.mxu0 %v406_v3 }
 0x166   :  { %371 = vmatpush3.msk.msra.mxu0 %vm75_vm3, %v24_v0  ;;  %372 = vmatprep.mubr.msk.f32.mxu0 %vm407_vm1, %v406_v3 }
 0x169   :  { %373 = vmatmul.mubr.msk.f32.vlgmr.msra.gmra.mxu0 %vm244_vm6, %v27_v27 }
 0x225   :  { %v150_v21 = vpop.f32.mrf.mxu0 }
 0x226   :  { %v151_v22 = vadd.f32 %v150_v21, %v32_v20 }
 0x227   :  { %v360_v23 = vpop.f32.mrf.mxu0 }
 0x228   :  { %v154_v24 = vmax.f32 %v151_v22, 0.0 }
 0x229   :  { %v316_v34 = vpop.f32.mrf.mxu0 }
 0x22a   :  { %155 = vrot.lane.b32.xlu1 %v154_v24, %s405_s23 }
 0x22b   :  { %v374_v35 = vpop.f32.mrf.mxu0 }
 0x29c   :  { %v156_v25 = vpop.permute.xlu1 %155 }
 0x29d   :  { %v157_v26 = vsel %vm55_vm0, %v156_v25, %v154_v24 }
 0x29e   :  { %158 = vrot.lane.b32.xlu1 %v157_v26, %s405_s23 }
 0x310   :  { %v159_v28 = vpop.permute.xlu1 %158 }
 0x311   :  { %v160_v29 = vsel %vm55_vm0, %v159_v28, %v154_v24 }
 0x312   :  { %162 = vrot.lane.b32.xlu1 %v160_v29, %s410_s26  ;;  %166 = vrot.lane.b32.xlu0 %v160_v29, %s409_s25 }
 0x316   :  { %37 = vperm.xlu0 %382, %v34_v30  }
 0x384   :  { %v167_v31 = vpop.permute.xlu0 %166  ;;  %v163_v33 = vpop.permute.xlu1 %162 }
 0x385   :  { %362 = vmatpush3.msk.msra.mxu1 %vm338_vm7, %v167_v31 }
 0x386   :  { %363 = vmatprep.subr.mxu1 %v406_v3 }
 0x387   :  { %364 = vmatpush3.msra.mxu1 %v154_v24 }
 0x388   :  { %365 = vmatprep.subr.mxu1 %v406_v3 }
 0x389   :  { %366 = vmatpush3.msk.msra.mxu1 %vm340_vm8, %v163_v33 }
 0x38a   :  { %368 = vmatmul.mubr.msk.f32.vlgmr.msra.gmra.mxu1 %vm170_vm9, %v26_v32 }
 0x391   :  { %v38_v36 = vpop.permute.xlu0 %37 }
 0x44a   :  { %v240_v37 = vpop.f32.mrf.mxu1 }
 0x44b   :  { %v241_v38 = vadd.f32 %v240_v37, %v38_v36 }
 0x44c   :  { %v369_v39 = vpop.f32.mrf.mxu1 }
 0x44d   :  { %v317_v40 = vadd.f32 %v316_v34, %v241_v38 }
 0x44f   :  { %321 = vst.msk [vmem:[#allocation2] sm:$0xff] %vm320_vm10, %v317_v40 }
 0x450   :  { %394 = shalt.err (!%p391_p4)
}
 0x451   :  { %331 = dma.vmem_to_hbm [thread:$0]  %s329_s8, 128, %s514_s6, [#allocation3]  }
 0x452   :  { %403 = dma.done.wait [#allocation3], 128  }
 0x453   :  { %404 = vsyncadd [#allocation3], 4294967168 }
 0x454   :  { %335 = vsyncpa [#allocation3], 1 }

</bundles_post_ra>
